<compile_context>
chip_gen: v7x
topology: tpu7x:2x2x1
jax: 0.10.0
libtpu: 0.0.40
codegen_flags: <defaults>
</compile_context>

<pallas_src>
import functools

import jax
import jax.numpy as jnp
from jax.experimental import pallas as pl
from jax.experimental.pallas import tpu as pltpu


def _outconv_kernel_vpu(x_ref, w_ref, b_ref, o_ref):
    # x_ref: (Cin, thw), w_ref: (Cout, Cin), b_ref: (Cout, 1), o_ref: (Cout, thw)
    x = x_ref[...]
    w = w_ref[...]
    cout, cin = w.shape
    thw = x.shape[-1]
    # Start from the bias (sublane value broadcast along dense lanes).
    acc = jnp.broadcast_to(b_ref[...], (cout, thw)).astype(jnp.float32)
    # Static unroll: Cin broadcast-FMAs on the VPU (MXU would be <1% utilized).
    for ci in range(cin):
        acc = acc + (w[:, ci:ci + 1].astype(jnp.float32) *
                     x[ci:ci + 1, :].astype(jnp.float32))
    o_ref[...] = acc.astype(o_ref.dtype)


def _outconv_kernel_mxu(x_ref, w_ref, b_ref, o_ref):
    # Used when the channel counts are big enough to make the MXU worthwhile.
    acc = jnp.dot(w_ref[...], x_ref[...], preferred_element_type=jnp.float32)
    o_ref[...] = (acc + b_ref[...]).astype(o_ref.dtype)


@functools.partial(jax.jit, static_argnames=("max_tile",))
def outconv(x, weight, bias, *, max_tile=8192):
    """1x1 Conv2d (stride 1, no padding) == per-pixel channel matmul.

    x:      (N, Cin, H, W)    (NCHW, PyTorch convention)
    weight: (Cout, Cin, 1, 1) (PyTorch Conv2d weight layout)
    bias:   (Cout,)
    returns (N, Cout, H, W)
    """
    N, Cin, H, W = x.shape
    Cout = weight.shape[0]
    HW = H * W

    # Free reshapes only — no transposes, no extra HBM traffic.
    x3 = x.reshape(N, Cin, HW)          # (N, Cin, HW), HW on the lane axis
    w_mat = weight.reshape(Cout, Cin)   # (Cout, Cin)
    b_mat = bias.reshape(Cout, 1)       # (Cout, 1)

    # Spatial tile: lane-dense (multiple of 128) and as large as sensible;
    # otherwise use the full extent (always a legal block shape).
    if HW % 128 == 0:
        thw = min(HW, max_tile)
    else:
        thw = HW
    n_hw = pl.cdiv(HW, thw)             # partial tail block is masked by Pallas

    kernel = _outconv_kernel_vpu if Cin <= 32 else _outconv_kernel_mxu

    itemsize = x.dtype.itemsize
    cost = pl.CostEstimate(
        flops=2 * N * HW * Cin * Cout,
        transcendentals=0,
        bytes_accessed=itemsize * (N * HW * Cin + N * HW * Cout + Cin * Cout + Cout),
    )

    out3 = pl.pallas_call(
        kernel,
        out_shape=jax.ShapeDtypeStruct((N, Cout, HW), x.dtype),
        grid_spec=pltpu.PrefetchScalarGridSpec(
            num_scalar_prefetch=0,
            grid=(N, n_hw),
            in_specs=[
                # (Cin, thw) block of one image; batch dim squeezed out.
                pl.BlockSpec((None, Cin, thw), lambda n, i: (n, 0, i)),
                # Small weights / bias: VMEM-resident, constant index_map.
                pl.BlockSpec((Cout, Cin), lambda n, i: (0, 0)),
                pl.BlockSpec((Cout, 1), lambda n, i: (0, 0)),
            ],
            out_specs=pl.BlockSpec((None, Cout, thw), lambda n, i: (n, 0, i)),
        ),
        compiler_params=pltpu.CompilerParams(
            dimension_semantics=("parallel", "parallel"),
        ),
        cost_estimate=cost,
    )(x3, w_mat, b_mat)

    return out3.reshape(N, Cout, H, W)


if __name__ == "__main__":
    # Deterministic synthetic parameters (shapes from OutConv.__init__).
    in_channels, out_channels = 4, 3
    N, H, W = 2, 16, 16

    key = jax.random.PRNGKey(0)
    kx, kw, kb = jax.random.split(key, 3)

    x = jax.random.normal(kx, (N, in_channels, H, W), dtype=jnp.float32)
    # PyTorch Conv2d weight shape: (out_channels, in_channels, 1, 1)
    weight = jax.random.normal(kw, (out_channels, in_channels, 1, 1),
                               dtype=jnp.float32) * 0.1
    bias = jax.random.normal(kb, (out_channels,), dtype=jnp.float32) * 0.1

    out = outconv(x, weight, bias)
    out = jax.block_until_ready(out)

    # Reference check against plain-JAX einsum (same semantics as Conv2d k=1).
    ref = jnp.einsum("nchw,oc->nohw", x,
                     weight.reshape(out_channels, in_channels))
    ref = ref + bias[None, :, None, None]
    assert out.shape == (N, out_channels, H, W)
    assert jnp.allclose(out, ref, atol=1e-5, rtol=1e-5)

    print("KERNEL_OK")
</pallas_src>

<mosaic_0001>
module attributes {stable_mosaic.version = 11 : i64} {
  func.func @_outconv_kernel_vpu(%arg0: i32, %arg1: i32, %arg2: memref<1x4x256xf32, #tpu.memory_space<vmem>>, %arg3: memref<3x4xf32, #tpu.memory_space<vmem>>, %arg4: memref<3x1xf32, #tpu.memory_space<vmem>>, %arg5: memref<1x3x256xf32, #tpu.memory_space<vmem>>) attributes {dimension_semantics = [#tpu.dimension_semantics<parallel>, #tpu.dimension_semantics<parallel>], iteration_bounds = array<i64: 2, 1>, scalar_prefetch = 0 : i64, scratch_operands = 0 : i64, tpu.core_type = #tpu.core_type<tc>, window_params = [{transform_indices = @transform_0, window_bounds = array<i64: 1, 4, 256>}, {pipeline_mode = #tpu.pipeline_mode<synchronous>, transform_indices = @transform_1, window_bounds = array<i64: 3, 4>}, {pipeline_mode = #tpu.pipeline_mode<synchronous>, transform_indices = @transform_2, window_bounds = array<i64: 3, 1>}, {transform_indices = @transform_3, window_bounds = array<i64: 1, 3, 256>}]} {
    %c0 = arith.constant 0 : index
    %c0_0 = arith.constant 0 : index
    %c0_1 = arith.constant 0 : index
    %0 = vector.load %arg2[%c0, %c0_0, %c0_1] : memref<1x4x256xf32, #tpu.memory_space<vmem>>, vector<1x4x256xf32>
    %1 = vector.shape_cast %0 : vector<1x4x256xf32> to vector<4x256xf32>
    %c0_2 = arith.constant 0 : index
    %c0_3 = arith.constant 0 : index
    %2 = vector.load %arg3[%c0_2, %c0_3] : memref<3x4xf32, #tpu.memory_space<vmem>>, vector<3x4xf32>
    %c0_4 = arith.constant 0 : index
    %c0_5 = arith.constant 0 : index
    %3 = vector.load %arg4[%c0_4, %c0_5] : memref<3x1xf32, #tpu.memory_space<vmem>>, vector<3x1xf32>
    %4 = vector.shape_cast %3 : vector<3x1xf32> to vector<3x1xf32>
    %5 = vector.broadcast %4 : vector<3x1xf32> to vector<3x256xf32>
    %6 = vector.extract_strided_slice %2 {offsets = [0, 0], sizes = [3, 1], strides = [1, 1]} : vector<3x4xf32> to vector<3x1xf32>
    %7 = vector.extract_strided_slice %1 {offsets = [0, 0], sizes = [1, 256], strides = [1, 1]} : vector<4x256xf32> to vector<1x256xf32>
    %8 = vector.broadcast %6 : vector<3x1xf32> to vector<3x256xf32>
    %9 = vector.broadcast %7 : vector<1x256xf32> to vector<3x256xf32>
    %10 = arith.mulf %8, %9 : vector<3x256xf32>
    %11 = arith.addf %5, %10 : vector<3x256xf32>
    %12 = vector.extract_strided_slice %2 {offsets = [0, 1], sizes = [3, 1], strides = [1, 1]} : vector<3x4xf32> to vector<3x1xf32>
    %13 = vector.extract_strided_slice %1 {offsets = [1, 0], sizes = [1, 256], strides = [1, 1]} : vector<4x256xf32> to vector<1x256xf32>
    %14 = vector.broadcast %12 : vector<3x1xf32> to vector<3x256xf32>
    %15 = vector.broadcast %13 : vector<1x256xf32> to vector<3x256xf32>
    %16 = arith.mulf %14, %15 : vector<3x256xf32>
    %17 = arith.addf %11, %16 : vector<3x256xf32>
    %18 = vector.extract_strided_slice %2 {offsets = [0, 2], sizes = [3, 1], strides = [1, 1]} : vector<3x4xf32> to vector<3x1xf32>
    %19 = vector.extract_strided_slice %1 {offsets = [2, 0], sizes = [1, 256], strides = [1, 1]} : vector<4x256xf32> to vector<1x256xf32>
    %20 = vector.broadcast %18 : vector<3x1xf32> to vector<3x256xf32>
    %21 = vector.broadcast %19 : vector<1x256xf32> to vector<3x256xf32>
    %22 = arith.mulf %20, %21 : vector<3x256xf32>
    %23 = arith.addf %17, %22 : vector<3x256xf32>
    %24 = vector.extract_strided_slice %2 {offsets = [0, 3], sizes = [3, 1], strides = [1, 1]} : vector<3x4xf32> to vector<3x1xf32>
    %25 = vector.extract_strided_slice %1 {offsets = [3, 0], sizes = [1, 256], strides = [1, 1]} : vector<4x256xf32> to vector<1x256xf32>
    %26 = vector.broadcast %24 : vector<3x1xf32> to vector<3x256xf32>
    %27 = vector.broadcast %25 : vector<1x256xf32> to vector<3x256xf32>
    %28 = arith.mulf %26, %27 : vector<3x256xf32>
    %29 = arith.addf %23, %28 : vector<3x256xf32>
    %c0_6 = arith.constant 0 : index
    %c0_7 = arith.constant 0 : index
    %c0_8 = arith.constant 0 : index
    %30 = vector.load %arg5[%c0_6, %c0_7, %c0_8] : memref<1x3x256xf32, #tpu.memory_space<vmem>>, vector<1x3x256xf32>
    %31 = vector.shape_cast %30 : vector<1x3x256xf32> to vector<3x256xf32>
    %32 = vector.shape_cast %29 : vector<3x256xf32> to vector<1x3x256xf32>
    tpu.vector_store %arg5[%c0_6, %c0_7, %c0_8], %32 {strides = array<i32>} : memref<1x3x256xf32, #tpu.memory_space<vmem>>, vector<1x3x256xf32>,
    return
  }
  func.func @transform_0(%arg0: i32, %arg1: i32) -> (i32, i32, i32) {
    %c0_i32 = arith.constant 0 : i32
    %c0_i32_0 = arith.constant 0 : i32
    return %arg0, %c0_i32, %arg1 : i32, i32, i32
  }
  func.func @transform_1(%arg0: i32, %arg1: i32) -> (i32, i32) {
    %c0_i32 = arith.constant 0 : i32
    %c0_i32_0 = arith.constant 0 : i32
    %c0_i32_1 = arith.constant 0 : i32
    return %c0_i32, %c0_i32_0 : i32, i32
  }
  func.func @transform_2(%arg0: i32, %arg1: i32) -> (i32, i32) {
    %c0_i32 = arith.constant 0 : i32
    %c0_i32_0 = arith.constant 0 : i32
    %c0_i32_1 = arith.constant 0 : i32
    return %c0_i32, %c0_i32_0 : i32, i32
  }
  func.func @transform_3(%arg0: i32, %arg1: i32) -> (i32, i32, i32) {
    %c0_i32 = arith.constant 0 : i32
    %c0_i32_0 = arith.constant 0 : i32
    return %arg0, %c0_i32, %arg1 : i32, i32, i32
  }
}

</mosaic_0001>

<bundles_post_ra>
// kernel: outconv.1
= control target key start
LH: loop header
LB: loop body
LE: loop exit
PB: predicated region body
PF: predicated region fallthrough
CT: control target
= control target key end

     0   :  { %s509_s12 = smov 0   ;;  %s511_s13 = smov 0   ;;  %s555_s0 = inlined_call_operand.vmem [shape: f32[2,4,256], index: 0, kind: input, shape index: {}]   ;;  %s556_s1 = inlined_call_operand.vmem [shape: f32[3,4], index: 1, kind: input, shape index: {}]   ;;  %s557_s2 = inlined_call_operand.vmem [shape: f32[3,1], index: 2, kind: input, shape index: {}]   ;;  %s558_s3 = inlined_call_operand.vmem [shape: f32[2,3,256], index: 3, kind: output, shape index: {}]  }
   0x1   :  { %s513_s14 = smov 0  }
   0x2 LB: > { %s25_s15 = sadd.s32 1, %s479_s13  ;;  %p420_p0 = scmp.ge.s32.totalorder %s483_s14, 1  ;;  %s483_s14 = sphi %s513_s14, %s13_s14   ;;  %s479_s13 = sphi %s511_s13, %s560_s13   ;;  %s475_s12 = sphi %s509_s12, %s559_s12  }
   0x3   : > { %p27_p1 = scmp.ge.s32.totalorder %s25_s15, 2  ;;  %p158_p2 = scmp.lt.s32.totalorder %s483_s14, 3 }
   0x5   : > { %s562_s15 = smov (%p27_p1, %s25_s15), 0  ;;  %p159_p3 = pnand %p420_p0, %p158_p2 }
   0x6   : > { %v211_v0 = vld [vmem:[%s556_s1] sm:$0x7] (!%p159_p3)  ;;  %v485_v1 = vmov (!%p159_p3), 0   ;;  %v486_v2 = vmov (!%p159_p3), 1   ;;  %v487_v4 = vmov (!%p159_p3), 2   ;;  %v488_v5 = vmov (!%p159_p3), 3  }
   0x7   : > { %162 = sbr.rel (%p159_p3) target bundleno = 152 (0x98), region = 32  ;;  %457 = vset.pattern.permute.xlu0 (!%p159_p3), %v485_v1  ;;  %458 = vset.pattern.permute.xlu1 (!%p159_p3), %v486_v2  ;;  %v212_v3 = vld [vmem:[%s557_s2] sm:$0x7] (!%p159_p3)  ;;  %p191_p4 = scmp.lt.s32.totalorder (!%p159_p3), %s475_s12, 1  ;;  %v224_v6 = vlaneseq (!%p159_p3) }
   0x8   : > { %220 = vperm.xlu0 (!%p159_p3), %457, %v211_v0   ;;  %247 = vperm.xlu1 (!%p159_p3), %458, %v211_v0  }
   0x9   : > { %v225_v7 = vshrl.u32 (!%p159_p3), %v224_v6, 7 }
   0xb   : > { %v226_v8 = vsub.s32 (!%p159_p3), 0, %v225_v7  ;;  %v230_v9 = vsub.s32 (!%p159_p3), 4, %v225_v7  ;;  %v252_v11 = vsub.s32 (!%p159_p3), 1, %v225_v7  ;;  %v256_v12 = vsub.s32 (!%p159_p3), 5, %v225_v7 }
   0xc   : > { %215 = vperm.xlu0 (!%p159_p3), %457, %v212_v3   ;;  %459 = vset.pattern.permute.xlu1 (!%p159_p3), %v487_v4  ;;  %v278_v13 = vsub.s32 (!%p159_p3), 2, %v225_v7  ;;  %v282_v14 = vsub.s32 (!%p159_p3), 6, %v225_v7  ;;  %v304_v21 = vsub.s32 (!%p159_p3), 3, %v225_v7  ;;  %v308_v22 = vsub.s32 (!%p159_p3), 7, %v225_v7 }
   0xd   : > { %273 = vperm.xlu1 (!%p159_p3), %459, %v211_v0  }
   0xe   : > { %s564_s12 = smov (!%p191_p4, %s475_s12), 1 }
   0xf   : > { %s427_s20 = sshll.u32 %s564_s12, 3 }
  0x10   : > { %460 = vset.pattern.permute.xlu0 %v488_v5  ;;  %s198_s23 = scalar_lea.vmem %s555_s0, %s427_s20  ;;  %s208_s26 = scalar_lea.vmem %s558_s3, %s427_s20 }
  0x11   : > { %299 = vperm.xlu0 %460, %v211_v0   ;;  %v210_v10 = vld [vmem:[%s198_s23] sm:$0xff] }
  0x12   : > { %v227_v15 = vrot.slane %v210_v10, %v226_v8  ;;  %v231_v16 = vrot.slane %v210_v10, %v230_v9  ;;  %v253_v17 = vrot.slane %v210_v10, %v252_v11  ;;  %v257_v18 = vrot.slane %v210_v10, %v256_v12 }
  0x13   : > { %v279_v19 = vrot.slane %v210_v10, %v278_v13  ;;  %v283_v20 = vrot.slane %v210_v10, %v282_v14  ;;  %v305_v31 = vrot.slane %v210_v10, %v304_v21  ;;  %v309_v32 = vrot.slane %v210_v10, %v308_v22 }
  0x14   : > { %v237_v23 = vrot.slane %v227_v15, %v226_v8  ;;  %v241_v24 = vrot.slane %v231_v16, %v226_v8  ;;  %v263_v27 = vrot.slane %v253_v17, %v252_v11  ;;  %v267_v28 = vrot.slane %v257_v18, %v252_v11 }
  0x15   : > { %v289_v29 = vrot.slane %v279_v19, %v278_v13  ;;  %v293_v30 = vrot.slane %v283_v20, %v278_v13  ;;  %v315_v43 = vrot.slane %v305_v31, %v304_v21  ;;  %v319_v44 = vrot.slane %v309_v32, %v304_v21 }
  0x87   : > { %v221_v25 = vpop.permute.xlu0 %220  ;;  %v248_v26 = vpop.permute.xlu1 %247 }
  0x88   : > { %v242_v33 = vmul.f32 %v237_v23, %v221_v25  ;;  %v243_v34 = vmul.f32 %v241_v24, %v221_v25  ;;  %v268_v36 = vmul.f32 %v263_v27, %v248_v26  ;;  %v269_v37 = vmul.f32 %v267_v28, %v248_v26 }
  0x8b   : > { %v216_v35 = vpop.permute.xlu0 %215 }
  0x8c   : > { %v244_v38 = vadd.f32 %v242_v33, %v216_v35  ;;  %v245_v39 = vadd.f32 %v243_v34, %v216_v35  ;;  %v274_v40 = vpop.permute.xlu1 %273 }
  0x8d   : > { %v294_v41 = vmul.f32 %v289_v29, %v274_v40  ;;  %v295_v42 = vmul.f32 %v293_v30, %v274_v40 }
  0x8e   : > { %v270_v45 = vadd.f32 %v268_v36, %v244_v38  ;;  %v271_v46 = vadd.f32 %v269_v37, %v245_v39 }
  0x90   : > { %v296_v47 = vadd.f32 %v294_v41, %v270_v45  ;;  %v297_v48 = vadd.f32 %v295_v42, %v271_v46  ;;  %v300_v49 = vpop.permute.xlu0 %299 }
  0x91   : > { %v320_v50 = vmul.f32 %v315_v43, %v300_v49  ;;  %v321_v51 = vmul.f32 %v319_v44, %v300_v49 }
  0x93   : > { %v322_v52 = vadd.f32 %v320_v50, %v296_v47  ;;  %v323_v53 = vadd.f32 %v321_v51, %v297_v48 }
  0x95   : > { %v326_v54 = vcombine.low %v322_v52, %v323_v53 }
  0x97   : > { %328 = vst [vmem:[%s208_s26] sm:$0x77] %v326_v54 }
  0x98 PF: > { %s13_s14 = sadd.s32 1, %s483_s14   ;;  %s559_s12 = smov %s479_s13 }
  0x99   : > { %p10_p5 = scmp.ge.s32.totalorder %s13_s14, 4   ;;  %s560_s13 = smov %s562_s15 }
  0x9b   :  { %12 = sbr.rel (!%p10_p5) target bundleno = 2 (0x2), region = 62 }

</bundles_post_ra>
